<compile_context>
chip_gen: v5e
topology: v5e:2x2
jax: 0.10.0
libtpu: 0.0.40
codegen_flags: <defaults>
</compile_context>

<pallas_src>
import numpy as np
import jax
import jax.numpy as jnp
from jax import lax
from jax.experimental import pallas as pl
from jax.experimental.pallas import tpu as pltpu


def features_linear_kernel(idx_ref, off_ref, tableT_ref, bias_ref, out_ref):
    # idx_ref:    (F, TB)  int32   -- batch tile of per-field indices, batch on lanes
    # off_ref:    (F, 1)   int32   -- per-field vocabulary offsets
    # tableT_ref: (D, V)   float32 -- nn.Embedding weight, transposed (vocab on lanes)
    # bias_ref:   (D, 1)   float32
    # out_ref:    (D, TB)  float32 -- output tile, batch on lanes (lane-dense stores)
    idx = idx_ref[...] + off_ref[...]                              # (F, TB)
    num_fields, tb = idx.shape
    vocab = tableT_ref.shape[1]

    # Multi-hot counts with vocab on sublanes / batch on lanes:
    #   counts_T[v, b] = number of fields whose (offset) index hits vocab row v
    # so   sum_f table[idx[f, b], :]  ==  tableT @ counts_T   (single MXU matmul,
    # M=D, K=V, N=TB with TB=128 on the lane axis).
    sub_iota = lax.broadcasted_iota(jnp.int32, (vocab, tb), 0)     # (V, TB)
    counts_T = jnp.zeros((vocab, tb), dtype=jnp.float32)
    for f in range(num_fields):                                    # F is tiny; static unroll
        counts_T = counts_T + (idx[f:f + 1, :] == sub_iota).astype(jnp.float32)

    out_t = jnp.dot(tableT_ref[...], counts_T,
                    preferred_element_type=jnp.float32)            # (D, TB)
    out_ref[...] = (out_t + bias_ref[...]).astype(out_ref.dtype)


def features_linear(x_idx, offsets, table, bias, *, block_b=128):
    """x_idx: (B, F) int ; offsets: (F,) int ; table: (V, D) f32 ; bias: (D,) f32."""
    B, F = x_idx.shape
    V, D = table.shape

    tb = block_b
    b_pad = ((B + tb - 1) // tb) * tb                  # pad batch to lane-aligned tiles

    # Layout plumbing (wrapper side): batch on the last (lane) axis everywhere.
    x_t = jnp.transpose(x_idx.astype(jnp.int32))       # (F, B)
    if b_pad != B:
        # Padded columns use index 0 (valid table row); their outputs are sliced off.
        x_t = jnp.pad(x_t, ((0, 0), (0, b_pad - B)))
    off2d = offsets.reshape(F, 1).astype(jnp.int32)
    tableT = jnp.transpose(table.astype(jnp.float32))  # (D, V)
    bias2d = bias.reshape(D, 1).astype(jnp.float32)

    grid = (b_pad // tb,)

    out_t = pl.pallas_call(
        features_linear_kernel,
        out_shape=jax.ShapeDtypeStruct((D, b_pad), jnp.float32),
        grid_spec=pltpu.PrefetchScalarGridSpec(
            num_scalar_prefetch=0,
            grid=grid,
            in_specs=[
                pl.BlockSpec((F, tb), lambda i: (0, i)),   # indices: batch tile on lanes
                pl.BlockSpec((F, 1), lambda i: (0, 0)),    # offsets, resident
                pl.BlockSpec((D, V), lambda i: (0, 0)),    # table (transposed), resident
                pl.BlockSpec((D, 1), lambda i: (0, 0)),    # bias, resident
            ],
            out_specs=pl.BlockSpec((D, tb), lambda i: (0, i)),
        ),
        compiler_params=pltpu.CompilerParams(
            dimension_semantics=("parallel",),
            vmem_limit_bytes=32 * 1024 * 1024,
        ),
    )(x_t, off2d, tableT, bias2d)

    return jnp.transpose(out_t)[:B]                    # (B, D)


def _reference(x_idx, offsets, table, bias):
    gathered = jnp.take(table, x_idx + offsets[None, :], axis=0)   # (B, F, D)
    return gathered.sum(axis=1) + bias[None, :]                    # (B, D)


if __name__ == "__main__":
    # Module configuration (synthetic, deterministic).
    field_dims = (5, 7, 11, 13)          # num_fields = 4, vocab = 36
    output_dim = 1
    vocab = int(sum(field_dims))
    num_fields = len(field_dims)

    # offsets = (0, *cumsum(field_dims)[:-1])
    offsets = jnp.asarray(
        np.concatenate(([0], np.cumsum(field_dims)[:-1])), dtype=jnp.int32
    )

    key = jax.random.PRNGKey(0)
    k_w, k_b, k_x1, k_x2 = jax.random.split(key, 4)
    table = jax.random.normal(k_w, (vocab, output_dim), dtype=jnp.float32)
    bias = jax.random.normal(k_b, (output_dim,), dtype=jnp.float32)

    def make_indices(k, batch):
        cols = [
            np.asarray(
                jax.random.randint(jax.random.fold_in(k, f), (batch,), 0, field_dims[f])
            )
            for f in range(num_fields)
        ]
        return jnp.asarray(np.stack(cols, axis=1).astype(np.int32))   # (B, F)

    # Small check (single padded tile, batch = 2).
    x_small = make_indices(k_x1, 2)
    out_small = jax.block_until_ready(features_linear(x_small, offsets, table, bias))
    ref_small = _reference(x_small, offsets, table, bias)
    np.testing.assert_allclose(
        np.asarray(out_small), np.asarray(ref_small), rtol=1e-6, atol=1e-6
    )

    # Larger check exercising the batch grid + padding path (B=300 -> 3 tiles of 128).
    x_big = make_indices(k_x2, 300)
    out_big = jax.block_until_ready(features_linear(x_big, offsets, table, bias))
    ref_big = _reference(x_big, offsets, table, bias)
    np.testing.assert_allclose(
        np.asarray(out_big), np.asarray(ref_big), rtol=1e-6, atol=1e-6
    )

    print("KERNEL_OK")
</pallas_src>

<mosaic_0001>
module attributes {stable_mosaic.version = 11 : i64} {
  func.func @features_linear_kernel(%arg0: i32, %arg1: memref<4x128xi32, #tpu.memory_space<vmem>>, %arg2: memref<4x1xi32, #tpu.memory_space<vmem>>, %arg3: memref<1x36xf32, #tpu.memory_space<vmem>>, %arg4: memref<1x1xf32, #tpu.memory_space<vmem>>, %arg5: memref<1x128xf32, #tpu.memory_space<vmem>>) attributes {dimension_semantics = [#tpu.dimension_semantics<parallel>], iteration_bounds = array<i64: 1>, scalar_prefetch = 0 : i64, scratch_operands = 0 : i64, tpu.core_type = #tpu.core_type<tc>, window_params = [{transform_indices = @transform_0, window_bounds = array<i64: 4, 128>}, {pipeline_mode = #tpu.pipeline_mode<synchronous>, transform_indices = @transform_1, window_bounds = array<i64: 4, 1>}, {pipeline_mode = #tpu.pipeline_mode<synchronous>, transform_indices = @transform_2, window_bounds = array<i64: 1, 36>}, {pipeline_mode = #tpu.pipeline_mode<synchronous>, transform_indices = @transform_3, window_bounds = array<i64: 1, 1>}, {transform_indices = @transform_4, window_bounds = array<i64: 1, 128>}]} {
    %c0 = arith.constant 0 : index
    %c0_0 = arith.constant 0 : index
    %0 = vector.load %arg1[%c0, %c0_0] : memref<4x128xi32, #tpu.memory_space<vmem>>, vector<4x128xi32>
    %c0_1 = arith.constant 0 : index
    %c0_2 = arith.constant 0 : index
    %1 = vector.load %arg2[%c0_1, %c0_2] : memref<4x1xi32, #tpu.memory_space<vmem>>, vector<4x1xi32>
    %2 = vector.broadcast %1 : vector<4x1xi32> to vector<4x128xi32>
    %3 = arith.addi %0, %2 : vector<4x128xi32>
    %4 = tpu.iota {dimensions = array<i32: 0>} : vector<36x128xi32>
    %cst = arith.constant 0.000000e+00 : f32
    %5 = vector.broadcast %cst : f32 to vector<36x128xf32>
    %6 = vector.extract_strided_slice %3 {offsets = [0, 0], sizes = [1, 128], strides = [1, 1]} : vector<4x128xi32> to vector<1x128xi32>
    %7 = vector.broadcast %6 : vector<1x128xi32> to vector<36x128xi32>
    %8 = arith.cmpi eq, %7, %4 : vector<36x128xi32>
    %9 = arith.extui %8 : vector<36x128xi1> to vector<36x128xi32>
    %10 = arith.sitofp %9 : vector<36x128xi32> to vector<36x128xf32>
    %11 = arith.addf %5, %10 : vector<36x128xf32>
    %12 = vector.extract_strided_slice %3 {offsets = [1, 0], sizes = [1, 128], strides = [1, 1]} : vector<4x128xi32> to vector<1x128xi32>
    %13 = vector.broadcast %12 : vector<1x128xi32> to vector<36x128xi32>
    %14 = arith.cmpi eq, %13, %4 : vector<36x128xi32>
    %15 = arith.extui %14 : vector<36x128xi1> to vector<36x128xi32>
    %16 = arith.sitofp %15 : vector<36x128xi32> to vector<36x128xf32>
    %17 = arith.addf %11, %16 : vector<36x128xf32>
    %18 = vector.extract_strided_slice %3 {offsets = [2, 0], sizes = [1, 128], strides = [1, 1]} : vector<4x128xi32> to vector<1x128xi32>
    %19 = vector.broadcast %18 : vector<1x128xi32> to vector<36x128xi32>
    %20 = arith.cmpi eq, %19, %4 : vector<36x128xi32>
    %21 = arith.extui %20 : vector<36x128xi1> to vector<36x128xi32>
    %22 = arith.sitofp %21 : vector<36x128xi32> to vector<36x128xf32>
    %23 = arith.addf %17, %22 : vector<36x128xf32>
    %24 = vector.extract_strided_slice %3 {offsets = [3, 0], sizes = [1, 128], strides = [1, 1]} : vector<4x128xi32> to vector<1x128xi32>
    %25 = vector.broadcast %24 : vector<1x128xi32> to vector<36x128xi32>
    %26 = arith.cmpi eq, %25, %4 : vector<36x128xi32>
    %27 = arith.extui %26 : vector<36x128xi1> to vector<36x128xi32>
    %28 = arith.sitofp %27 : vector<36x128xi32> to vector<36x128xf32>
    %29 = arith.addf %23, %28 : vector<36x128xf32>
    %c0_3 = arith.constant 0 : index
    %c0_4 = arith.constant 0 : index
    %30 = vector.load %arg3[%c0_3, %c0_4] : memref<1x36xf32, #tpu.memory_space<vmem>>, vector<1x36xf32>
    %cst_5 = arith.constant dense<0.000000e+00> : vector<1x128xf32>
    %31 = tpu.matmul %30, %29, %cst_5 {dimension_numbers = #tpu.dot_dimension_numbers<[1], [0], [0], [1], [0, 0, 1, 1], [], []>} : vector<1x36xf32>, vector<36x128xf32>, vector<1x128xf32> -> vector<1x128xf32>
    %c0_6 = arith.constant 0 : index
    %c0_7 = arith.constant 0 : index
    %32 = vector.load %arg4[%c0_6, %c0_7] : memref<1x1xf32, #tpu.memory_space<vmem>>, vector<1x1xf32>
    %33 = vector.broadcast %32 : vector<1x1xf32> to vector<1x128xf32>
    %34 = arith.addf %31, %33 : vector<1x128xf32>
    %c0_8 = arith.constant 0 : index
    %c0_9 = arith.constant 0 : index
    %35 = vector.load %arg5[%c0_8, %c0_9] : memref<1x128xf32, #tpu.memory_space<vmem>>, vector<1x128xf32>
    tpu.vector_store %arg5[%c0_8, %c0_9], %34 {strides = array<i32>} : memref<1x128xf32, #tpu.memory_space<vmem>>, vector<1x128xf32>,
    return
  }
  func.func @transform_0(%arg0: i32) -> (i32, i32) {
    %c0_i32 = arith.constant 0 : i32
    %c0_i32_0 = arith.constant 0 : i32
    return %c0_i32, %arg0 : i32, i32
  }
  func.func @transform_1(%arg0: i32) -> (i32, i32) {
    %c0_i32 = arith.constant 0 : i32
    %c0_i32_0 = arith.constant 0 : i32
    %c0_i32_1 = arith.constant 0 : i32
    return %c0_i32, %c0_i32_0 : i32, i32
  }
  func.func @transform_2(%arg0: i32) -> (i32, i32) {
    %c0_i32 = arith.constant 0 : i32
    %c0_i32_0 = arith.constant 0 : i32
    %c0_i32_1 = arith.constant 0 : i32
    return %c0_i32, %c0_i32_0 : i32, i32
  }
  func.func @transform_3(%arg0: i32) -> (i32, i32) {
    %c0_i32 = arith.constant 0 : i32
    %c0_i32_0 = arith.constant 0 : i32
    %c0_i32_1 = arith.constant 0 : i32
    return %c0_i32, %c0_i32_0 : i32, i32
  }
  func.func @transform_4(%arg0: i32) -> (i32, i32) {
    %c0_i32 = arith.constant 0 : i32
    %c0_i32_0 = arith.constant 0 : i32
    return %c0_i32, %arg0 : i32, i32
  }
}

</mosaic_0001>

<bundles_post_ra>
// kernel: tpu_custom_call.1
= control target key start
LH: loop header
LB: loop body
LE: loop exit
PB: predicated region body
PF: predicated region fallthrough
CT: control target
= control target key end

     0   :  { %s275_s0 = inlined_call_operand.vmem [shape: s32[4,128], index: 0, kind: input, shape index: {}]   ;;  %s276_s1 = inlined_call_operand.vmem [shape: s32[4,1], index: 1, kind: input, shape index: {}]   ;;  %s277_s2 = inlined_call_operand.vmem [shape: f32[1,36], index: 2, kind: input, shape index: {}]   ;;  %s278_s3 = inlined_call_operand.<no memory space> [shape: f32[1,1], index: 3, kind: input, shape index: {}]   ;;  %s279_s4 = inlined_call_operand.hbm [shape: f32[1,128], index: 4, kind: output, shape index: {}]  }
   0x1   :  { %v9_v0 = vstv %s278_s3 }
   0x2   :  { %10 = vst [vmem:[#allocation2] sm:$0x1] %v9_v0 }
   0x3   :  { %v21_v1 = vld [vmem:[%s276_s1] sm:$0xf]  ;;  %v221_v2 = vmov 0  }
   0x4   :  { %194 = vset.pattern.permute.xlu0 %v221_v2 }
   0x5   :  { %11 = vsyncpa [#allocation4], 0  ;;  %23 = vperm.xlu0 %194, %v21_v1   ;;  %v26_v4 = vlaneseq  ;;  %v20_v6 = vld [vmem:[%s275_s0] sm:$0xf]  ;;  %v222_v16 = vmov 0.0   ;;  %vm128_vm4 = vcmask 1043456  }
   0x6   :  { %v116_v53 = vld [vmem:[%s277_s2] sm:$0x1]  ;;  %s223_s3 = smov [#allocation3]   ;;  %s160_s24 = sshll.u32 %s279_s4, 4  ;;  %s161_s24 = int_to_ptr.hbm [resolvable:$true] %s160_s24 }
   0x7   :  { %v255_v5 = vshrl.u32 %v26_v4, 7  ;;  %s158_s21 = sshll.u32 %s223_s3, 4  ;;  %s159_s21 = int_to_ptr.vmem [resolvable:$true] %s158_s21 }
   0x9   :  { %v117_v3 = vld [vmem:[#allocation2] sm:$0x1]  ;;  %v31_v9 = vadd.s32 32, %v255_v5  ;;  %v30_v10 = vadd.s32 24, %v255_v5  ;;  %v29_v15 = vadd.s32 16, %v255_v5  ;;  %v28_v19 = vadd.s32 8, %v255_v5 }
   0xd   :  { %120 = vperm.xlu0 %194, %v117_v3  }
  0x77   :  { %v24_v7 = vpop.permute.xlu0 %23 }
  0x78   :  { %v25_v8 = vadd.s32 %v24_v7, %v20_v6 }
  0x7a   :  { %v32_v11 = vperm.slane %v25_v8, 0  ;;  %v53_v12 = vperm.slane %v25_v8, 1  ;;  %v74_v13 = vperm.slane %v25_v8, 2  ;;  %v95_v14 = vperm.slane %v25_v8, 3 }
  0x7c   :  { %vm37_vm0 = vcmp.eq.s32.totalorder %v32_v11, %v31_v9  ;;  %vm58_vm1 = vcmp.eq.s32.totalorder %v53_v12, %v31_v9  ;;  %vm79_vm2 = vcmp.eq.s32.totalorder %v74_v13, %v31_v9  ;;  %vm100_vm3 = vcmp.eq.s32.totalorder %v95_v14, %v31_v9 }
  0x7d   :  { %v173_v17 = vsel %vm37_vm0, 1.0, %v222_v16  ;;  %v178_v18 = vsel %vm58_vm1, 1.0, %v222_v16  ;;  %vm36_vm5 = vcmp.eq.s32.totalorder %v32_v11, %v30_v10  ;;  %vm57_vm6 = vcmp.eq.s32.totalorder %v53_v12, %v30_v10 }
  0x7e   :  { %v73_v20 = vadd.f32 %v178_v18, %v173_v17  ;;  %vm78_vm7 = vcmp.eq.s32.totalorder %v74_v13, %v30_v10  ;;  %v183_v21 = vsel %vm79_vm2, 1.0, %v222_v16  ;;  %v188_v22 = vsel %vm100_vm3, 1.0, %v222_v16 }
  0x7f   :  { %v172_v23 = vsel %vm36_vm5, 1.0, %v222_v16  ;;  %v177_v24 = vsel %vm57_vm6, 1.0, %v222_v16  ;;  %v182_v27 = vsel %vm78_vm7, 1.0, %v222_v16  ;;  %vm99_vm8 = vcmp.eq.s32.totalorder %v95_v14, %v30_v10  ;;  %v121_v54 = vpop.permute.xlu0 %120 }
  0x80   :  { %v94_v25 = vadd.f32 %v183_v21, %v73_v20  ;;  %v72_v26 = vadd.f32 %v177_v24, %v172_v23  ;;  %vm35_vm9 = vcmp.eq.s32.totalorder %v32_v11, %v29_v15  ;;  %vm56_vm10 = vcmp.eq.s32.totalorder %v53_v12, %v29_v15 }
  0x81   :  { %vm77_vm11 = vcmp.eq.s32.totalorder %v74_v13, %v29_v15  ;;  %vm98_vm12 = vcmp.eq.s32.totalorder %v95_v14, %v29_v15  ;;  %v171_v30 = vsel %vm35_vm9, 1.0, %v222_v16  ;;  %v176_v31 = vsel %vm56_vm10, 1.0, %v222_v16 }
  0x82   :  { %v115_v28 = vadd.f32 %v188_v22, %v94_v25  ;;  %v93_v29 = vadd.f32 %v182_v27, %v72_v26  ;;  %v187_v32 = vsel %vm99_vm8, 1.0, %v222_v16  ;;  %v71_v33 = vadd.f32 %v176_v31, %v171_v30 }
  0x83   :  { %v181_v34 = vsel %vm77_vm11, 1.0, %v222_v16  ;;  %vm34_vm13 = vcmp.eq.s32.totalorder %v32_v11, %v28_v19  ;;  %vm55_vm14 = vcmp.eq.s32.totalorder %v53_v12, %v28_v19  ;;  %vm76_vm15 = vcmp.eq.s32.totalorder %v74_v13, %v28_v19 }
  0x84   :  { %189 = vmatpush.msk.msra.mxu0 %vm128_vm4, %v115_v28  ;;  %v114_v35 = vadd.f32 %v187_v32, %v93_v29  ;;  %v170_v36 = vsel %vm34_vm13, 1.0, %v222_v16  ;;  %v92_v37 = vadd.f32 %v181_v34, %v71_v33  ;;  %v186_v38 = vsel %vm98_vm12, 1.0, %v222_v16 }
  0x85   :  { %v175_v39 = vsel %vm55_vm14, 1.0, %v222_v16  ;;  %v180_v40 = vsel %vm76_vm15, 1.0, %v222_v16  ;;  %vm97_vm0 = vcmp.eq.s32.totalorder %v95_v14, %v28_v19  ;;  %vm33_vm1 = vcmp.eq.s32.totalorder %v32_v11, %v255_v5 }
  0x86   :  { %144 = vmatpush.msra.mxu0 %v114_v35  ;;  %v70_v41 = vadd.f32 %v175_v39, %v170_v36  ;;  %vm54_vm2 = vcmp.eq.s32.totalorder %v53_v12, %v255_v5  ;;  %v113_v42 = vadd.f32 %v186_v38, %v92_v37  ;;  %v169_v43 = vsel %vm33_vm1, 1.0, %v222_v16 }
  0x87   :  { %v174_v44 = vsel %vm54_vm2, 1.0, %v222_v16  ;;  %vm75_vm3 = vcmp.eq.s32.totalorder %v74_v13, %v255_v5  ;;  %vm96_vm4 = vcmp.eq.s32.totalorder %v95_v14, %v255_v5  ;;  %v185_v47 = vsel %vm97_vm0, 1.0, %v222_v16 }
  0x88   :  { %v91_v45 = vadd.f32 %v180_v40, %v70_v41  ;;  %v69_v46 = vadd.f32 %v174_v44, %v169_v43  ;;  %145 = vmatpush.msra.mxu0 %v113_v42  ;;  %v179_v48 = vsel %vm75_vm3, 1.0, %v222_v16  ;;  %v184_v51 = vsel %vm96_vm4, 1.0, %v222_v16 }
  0x89   :  { %vm124_vm5 = vcmask 293888   ;;  %v123_v55 = vperm.slane %v121_v54, 0 }
  0x8a   :  { %v112_v49 = vadd.f32 %v185_v47, %v91_v45  ;;  %v90_v50 = vadd.f32 %v179_v48, %v69_v46 }
  0x8c   :  { %146 = vmatpush.msra.mxu0 %v112_v49  ;;  %v111_v52 = vadd.f32 %v184_v51, %v90_v50 }
  0x8e   :  { %147 = vmatpush.msra.mxu0 %v111_v52 }
  0x8f   :  { %190 = vmatmul.msk.f32.vlgmr.msra.gmra.mxu0 %vm124_vm5, %v116_v53 }
 0x10c   :  { %v149_v56 = vpop.f32.mrf.mxu0 }
 0x10d   :  { %v150_v57 = vadd.f32 %v149_v56, %v123_v55 }
 0x10f   :  { %152 = vst [vmem:[#allocation3] sm:$0x1] %v150_v57 }
 0x110   :  { %163 = dma.vmem_to_hbm [thread:$0]  %s159_s21, 16, %s161_s24, [#allocation4]  }
 0x111   :  { %219 = dma.done.wait [#allocation4], 16  }
 0x112   :  { %220 = vsyncadd [#allocation4], 4294967280 }
 0x113   :  { %168 = vsyncpa [#allocation4], 1 }

</bundles_post_ra>
